<compile_context>
chip_gen: v7x
topology: tpu7x:2x2x1
jax: 0.10.0
libtpu: 0.0.40
codegen_flags: <defaults>
</compile_context>

<pallas_src>
import math

import jax
import jax.numpy as jnp
from jax.experimental import pallas as pl
from jax.experimental.pallas import tpu as pltpu


def batch_stats_kernel(x_ref, sb_ref, y_ref, stats_ref):
    """One (TR, L) row-tile of x2 = x.reshape(N*C, H*W).

    sb_ref: (TR, 2) f32 params, column 0 = scale[row % C], column 1 = bias[row % C].
    y_ref:  (TR, L) affine output in the input dtype.
    stats_ref: (TR, 2) f32, column 0 = per-row sum, column 1 = per-row sum of squares.
    """
    x = x_ref[...]                                   # (TR, L), native dtype
    sb = sb_ref[...]                                 # (TR, 2), f32
    scale = sb[:, 0:1].astype(x.dtype)
    bias = sb[:, 1:2].astype(x.dtype)

    # Per-channel affine in the input dtype (lane-dense, full-width block store).
    y_ref[...] = (x * scale + bias).astype(y_ref.dtype)

    # Per-row partial statistics (f32 accumulation, XLU lane reduction only).
    xf = x.astype(jnp.float32)
    s = jnp.sum(xf, axis=1, keepdims=True)           # (TR, 1)
    q = jnp.sum(xf * xf, axis=1, keepdims=True)      # (TR, 1)
    stats_ref[...] = jnp.concatenate([s, q], axis=1)  # (TR, 2)


def _round_up(a, m):
    return -(-a // m) * m


def _pick_tile_rows(R, L, itemsize, C, target_block_bytes=2 << 20):
    """Largest row-tile TR with:
      - one (TR, L) block ~= target_block_bytes (2 MiB: ~85% of HBM roofline,
        per-step overhead amortized),
      - TR a multiple of the dtype-aware sublane count (8 f32 / 16 bf16 / 32 i8),
      - the 128-lane-padded (TR, 2) side buffers kept small even for tiny L,
      - >= 2 grid steps whenever splittable (v7x megacore),
      - TR a multiple of lcm(sublane, C) when possible, so the affine params
        can be grid-invariant (fetched once)."""
    sublane = {4: 8, 2: 16, 1: 32}.get(itemsize, 8)
    # Count the 128-lane padding of the (TR, 2) f32 side buffers in the per-row
    # budget so tiny-L shapes don't blow up VMEM.
    row_bytes = max(L * itemsize, 128 * 4)
    cap = max(sublane, (target_block_bytes // row_bytes) // sublane * sublane)
    r_pad = _round_up(R, sublane)
    cap = min(cap, r_pad)
    # Guarantee at least 2 grid steps when the row dim can be split at all.
    if r_pad > sublane:
        cap = min(cap, max(sublane, _round_up(-(-R // 2), sublane)))
    # Prefer grid-invariant params: TR multiple of lcm(sublane, C).
    unit = sublane * C // math.gcd(sublane, C)
    if unit <= cap:
        return (cap // unit) * unit
    return cap


def batch_statistics(x, scale, bias, *, target_block_bytes=2 << 20):
    """x: (N, C, H, W); scale, bias: (C,).  Returns (y, loss)."""
    N, C, H, W = x.shape
    R, L = N * C, H * W
    M = N * H * W                      # elements per flat row of the loss view

    # Zero-copy 2-D view of x; the kernel reads it exactly once.
    x2 = x.reshape(R, L)

    itemsize = jnp.dtype(x.dtype).itemsize
    TR = _pick_tile_rows(R, L, itemsize, C, target_block_bytes)
    num_tiles = -(-R // TR)            # ceil-div grid; partial last tile is masked
    grid = (num_tiles,)

    # Merged [scale, bias] slab.  Grid-invariant (DMA'd once) when every tile
    # starts on a channel boundary (TR % C == 0) or there is a single tile;
    # otherwise fall back to a per-row slab indexed per tile.
    grid_invariant = (TR % C == 0) or (num_tiles == 1)
    param_rows = TR if grid_invariant else num_tiles * TR
    ch = jnp.arange(param_rows) % C
    params = jnp.stack(
        [scale.astype(jnp.float32)[ch], bias.astype(jnp.float32)[ch]], axis=1
    )                                  # (param_rows, 2)
    if grid_invariant:
        sb_spec = pl.BlockSpec((TR, 2), lambda t: (0, 0))
    else:
        sb_spec = pl.BlockSpec((TR, 2), lambda t: (t, 0))

    y2, stats = pl.pallas_call(
        batch_stats_kernel,
        out_shape=(
            jax.ShapeDtypeStruct((R, L), x.dtype),
            jax.ShapeDtypeStruct((R, 2), jnp.float32),
        ),
        grid=grid,
        in_specs=[
            pl.BlockSpec((TR, L), lambda t: (t, 0)),
            sb_spec,
        ],
        out_specs=(
            pl.BlockSpec((TR, L), lambda t: (t, 0)),
            pl.BlockSpec((TR, 2), lambda t: (t, 0)),
        ),
        compiler_params=pltpu.CompilerParams(
            dimension_semantics=("parallel",),
            vmem_limit_bytes=32 * 1024 * 1024,
        ),
    )(x2, params)

    # ---- tiny O(N*C) epilogue: finish compute_loss from the per-row partials.
    # Flat loss row g == x2 rows [g*N, (g+1)*N)  ->  group-sum N consecutive rows.
    rsum = stats[:, 0]
    rsq = stats[:, 1]
    S = rsum.reshape(C, N).sum(axis=1)          # per-flat-row sum
    Q = rsq.reshape(C, N).sum(axis=1)           # per-flat-row sum of squares
    mean = S / M
    var = Q / M - mean * mean                   # matches reference (no eps clamp)
    lstd = 0.5 * jnp.log(var)                   # == log(sqrt(var))
    loss = jnp.mean(mean * mean + lstd * lstd)

    return y2.reshape(N, C, H, W), loss


if __name__ == "__main__":
    key = jax.random.PRNGKey(0)
    kx, ks, kb = jax.random.split(key, 3)
    N, C, H, W = 2, 4, 16, 16
    x = jax.random.normal(kx, (N, C, H, W), dtype=jnp.float32)

    # Affine default init is ones/zeros (scale_init=1.0); use non-trivial
    # deterministic parameter values so the per-row channel mapping is exercised.
    scale = 1.0 + 0.1 * jax.random.normal(ks, (C,), dtype=jnp.float32)
    bias = 0.1 * jax.random.normal(kb, (C,), dtype=jnp.float32)

    y, loss = batch_statistics(x, scale, bias)
    jax.block_until_ready((y, loss))

    # Pure-JAX reference mirroring the PyTorch module.
    xf = x.reshape(C, -1)
    mean_ref = xf.mean(axis=1)
    lstd_ref = jnp.log(jnp.sqrt((xf ** 2).mean(axis=1) - mean_ref ** 2))
    loss_ref = jnp.mean(mean_ref ** 2) + jnp.mean(lstd_ref ** 2)
    y_ref = x * scale[None, :, None, None] + bias[None, :, None, None]

    assert jnp.allclose(y, y_ref, rtol=1e-5, atol=1e-5), "affine output mismatch"
    assert jnp.allclose(loss, loss_ref, rtol=1e-5, atol=1e-6), "loss mismatch"

    print("KERNEL_OK")
</pallas_src>

<mosaic_0001>
module attributes {stable_mosaic.version = 11 : i64} {
  func.func @batch_stats_kernel(%arg0: i32, %arg1: memref<8x256xf32, #tpu.memory_space<vmem>>, %arg2: memref<8x2xf32, #tpu.memory_space<vmem>>, %arg3: memref<8x256xf32, #tpu.memory_space<vmem>>, %arg4: memref<8x2xf32, #tpu.memory_space<vmem>>) attributes {dimension_semantics = [#tpu.dimension_semantics<parallel>], iteration_bounds = array<i64: 1>, scalar_prefetch = 0 : i64, scratch_operands = 0 : i64, tpu.core_type = #tpu.core_type<tc>, window_params = [{transform_indices = @transform_0, window_bounds = array<i64: 8, 256>}, {pipeline_mode = #tpu.pipeline_mode<synchronous>, transform_indices = @transform_1, window_bounds = array<i64: 8, 2>}, {transform_indices = @transform_2, window_bounds = array<i64: 8, 256>}, {transform_indices = @transform_3, window_bounds = array<i64: 8, 2>}]} {
    %c0 = arith.constant 0 : index
    %c0_0 = arith.constant 0 : index
    %0 = vector.load %arg1[%c0, %c0_0] : memref<8x256xf32, #tpu.memory_space<vmem>>, vector<8x256xf32>
    %c0_1 = arith.constant 0 : index
    %c0_2 = arith.constant 0 : index
    %1 = vector.load %arg2[%c0_1, %c0_2] : memref<8x2xf32, #tpu.memory_space<vmem>>, vector<8x2xf32>
    %2 = vector.extract_strided_slice %1 {offsets = [0, 0], sizes = [8, 1], strides = [1, 1]} : vector<8x2xf32> to vector<8x1xf32>
    %3 = vector.extract_strided_slice %1 {offsets = [0, 1], sizes = [8, 1], strides = [1, 1]} : vector<8x2xf32> to vector<8x1xf32>
    %4 = vector.broadcast %2 : vector<8x1xf32> to vector<8x256xf32>
    %5 = arith.mulf %0, %4 : vector<8x256xf32>
    %6 = vector.broadcast %3 : vector<8x1xf32> to vector<8x256xf32>
    %7 = arith.addf %5, %6 : vector<8x256xf32>
    %c0_3 = arith.constant 0 : index
    %c0_4 = arith.constant 0 : index
    %8 = vector.load %arg3[%c0_3, %c0_4] : memref<8x256xf32, #tpu.memory_space<vmem>>, vector<8x256xf32>
    tpu.vector_store %arg3[%c0_3, %c0_4], %7 {strides = array<i32>} : memref<8x256xf32, #tpu.memory_space<vmem>>, vector<8x256xf32>,
    %cst = arith.constant dense<0.000000e+00> : vector<8xf32>
    %9 = vector.multi_reduction <add>, %0, %cst [1] : vector<8x256xf32> to vector<8xf32>
    %10 = vector.shape_cast %9 : vector<8xf32> to vector<8x1xf32>
    %11 = arith.mulf %0, %0 : vector<8x256xf32>
    %cst_5 = arith.constant dense<0.000000e+00> : vector<8xf32>
    %12 = vector.multi_reduction <add>, %11, %cst_5 [1] : vector<8x256xf32> to vector<8xf32>
    %13 = vector.shape_cast %12 : vector<8xf32> to vector<8x1xf32>
    %14 = tpu.concatenate %10, %13 in 1 : vector<8x1xf32>, vector<8x1xf32> -> vector<8x2xf32>
    %c0_6 = arith.constant 0 : index
    %c0_7 = arith.constant 0 : index
    %15 = vector.load %arg4[%c0_6, %c0_7] : memref<8x2xf32, #tpu.memory_space<vmem>>, vector<8x2xf32>
    tpu.vector_store %arg4[%c0_6, %c0_7], %14 {strides = array<i32>} : memref<8x2xf32, #tpu.memory_space<vmem>>, vector<8x2xf32>,
    return
  }
  func.func @transform_0(%arg0: i32) -> (i32, i32) {
    %c0_i32 = arith.constant 0 : i32
    %c0_i32_0 = arith.constant 0 : i32
    return %arg0, %c0_i32 : i32, i32
  }
  func.func @transform_1(%arg0: i32) -> (i32, i32) {
    %c0_i32 = arith.constant 0 : i32
    %c0_i32_0 = arith.constant 0 : i32
    %c0_i32_1 = arith.constant 0 : i32
    return %c0_i32, %c0_i32_0 : i32, i32
  }
  func.func @transform_2(%arg0: i32) -> (i32, i32) {
    %c0_i32 = arith.constant 0 : i32
    %c0_i32_0 = arith.constant 0 : i32
    return %arg0, %c0_i32 : i32, i32
  }
  func.func @transform_3(%arg0: i32) -> (i32, i32) {
    %c0_i32 = arith.constant 0 : i32
    %c0_i32_0 = arith.constant 0 : i32
    return %arg0, %c0_i32 : i32, i32
  }
}

</mosaic_0001>

<bundles_post_ra>
// kernel: tpu_custom_call.1
= control target key start
LH: loop header
LB: loop body
LE: loop exit
PB: predicated region body
PF: predicated region fallthrough
CT: control target
= control target key end

     0   :  { %9 = vsyncpa [#allocation3], 0  ;;  %s184_s0 = inlined_call_operand.hbm [shape: f32[8,256], index: 0, kind: input, shape index: {}]   ;;  %s185_s1 = inlined_call_operand.vmem [shape: f32[8,2], index: 1, kind: input, shape index: {}]   ;;  %s186_s2 = inlined_call_operand.hbm [shape: f32[8,256], index: 2, kind: output, shape index: {0}]   ;;  %s187_s3 = inlined_call_operand.vmem [shape: f32[8,2], index: 3, kind: output, shape index: {1}]  }
   0x1   :  { %10 = vsyncpa [#allocation4], 0  ;;  %s130_s12 = smov [#allocation2]   ;;  %s82_s16 = scalar_lea.hbm %s184_s0, 256 }
   0x2   :  { %s17_s13 = sshll.u32 %s130_s12, 4  ;;  %p83_p0 = scmp.ne.s32.totalorder %s184_s0, %s82_s16  ;;  %s18_s13 = int_to_ptr.vmem [resolvable:$true] %s17_s13 }
   0x3   :  { %p86_p1 = scmp.lt.u32.totalorder %s82_s16, %s184_s0 }
   0x5   :  { %p88_p2 = pnand %p86_p1, %p83_p0 }
   0x7   :  { %91 = shalt.err (!%p88_p2)
}
   0x8   :  { %s92_s21 = scalar_lea.vmem %s18_s13, 256  ;;  %p97_p4 = scmp.lt.s32.totalorder %s18_s13, %s18_s13 }
   0x9   :  { %p93_p3 = scmp.ne.s32.totalorder %s18_s13, %s92_s21  ;;  %p98_p5 = scmp.lt.s32.totalorder %s92_s21, %s92_s21 }
   0xb   :  { %p99_p6 = por %p98_p5, %p97_p4 }
   0xd   :  { %p100_p7 = pnand %p99_p6, %p93_p3 }
   0xf   :  { %103 = shalt.err (!%p100_p7)
}
  0x10   :  { %20 = dma.hbm_to_vmem [thread:$0]  %s184_s0, 256, %s18_s13, [#allocation3]  }
  0x11   :  { %126 = dma.done.wait [#allocation3], 256  }
  0x12   :  { %127 = vsyncadd [#allocation3], 4294967040  ;;  %v131_v0 = vmov 0   ;;  %v132_v1 = vmov 1   ;;  %v26_v2 = vld [vmem:[#allocation2] sm:$0xff]  ;;  %v27_v3 = vld [vmem:[#allocation2 + $0x8] sm:$0xff] }
  0x13   :  { %79 = vset.pattern.permute.xlu1 %v131_v0  ;;  %81 = vset.pattern.permute.xlu0 %v132_v1  ;;  %v28_v4 = vld [vmem:[%s185_s1] sm:$0xff]  ;;  %v44_v5 = vadd.f32 %v27_v3, %v26_v2  ;;  %v47_v6 = vmul.f32 %v26_v2, %v26_v2  ;;  %v48_v7 = vmul.f32 %v27_v3, %v27_v3  ;;  %s133_s0 = smov [#allocation5]  }
  0x14   :  { %31 = vperm.xlu1 %79, %v28_v4   ;;  %s62_s26 = sshll.u32 %s133_s0, 4  ;;  %s63_s26 = int_to_ptr.vmem [resolvable:$true] %s62_s26 }
  0x15   :  { %45 = vadd.xlane.f32.xlu0 %v44_v5  ;;  %v49_v8 = vadd.f32 %v48_v7, %v47_v6  ;;  %s104_s1 = scalar_lea.vmem %s63_s26, 256  ;;  %p109_p9 = scmp.lt.s32.totalorder %s63_s26, %s63_s26 }
  0x16   :  { %p105_p8 = scmp.ne.s32.totalorder %s63_s26, %s104_s1  ;;  %p110_p10 = scmp.lt.s32.totalorder %s104_s1, %s104_s1 }
  0x18   :  { %80 = vset.pattern.permute.xlu1 %v132_v1  ;;  %p111_p11 = por %p110_p10, %p109_p9 }
  0x19   :  { %37 = vperm.xlu1 %80, %v28_v4   ;;  %50 = vadd.xlane.f32.xlu0 %v49_v8 }
  0x1a   :  { %p112_p12 = pnand %p111_p11, %p105_p8 }
  0x93   :  { %v32_v9 = vpop.permute.xlu1 %31 }
  0x94   :  { %v34_v10 = vmul.f32 %v32_v9, %v26_v2  ;;  %v35_v11 = vmul.f32 %v32_v9, %v27_v3 }
  0x98   :  { %v38_v12 = vpop.permute.xlu1 %37 }
  0x99   :  { %v40_v13 = vadd.f32 %v38_v12, %v34_v10  ;;  %v41_v14 = vadd.f32 %v38_v12, %v35_v11 }
  0x9b   :  { %42 = vst [vmem:[#allocation5] sm:$0xff] %v40_v13  ;;  %43 = vst [vmem:[#allocation5 + $0x8] sm:$0xff] %v41_v14 }
  0x9c   :  { %115 = shalt.err (!%p112_p12)
}
  0x9d   :  { %s116_s29 = scalar_lea.hbm %s186_s2, 256 }
  0x9e   :  { %p117_p13 = scmp.ne.s32.totalorder %s186_s2, %s116_s29  ;;  %p120_p0 = scmp.lt.u32.totalorder %s116_s29, %s186_s2 }
  0xa0   :  { %p122_p1 = pnand %p120_p0, %p117_p13 }
  0xa2   :  { %125 = shalt.err (!%p122_p1)
}
  0xa3   :  { %65 = dma.vmem_to_hbm [thread:$0]  %s63_s26, 256, %s186_s2, [#allocation4]   ;;  %v46_v15 = vpop.xlane.xlu0 %45  ;;  %vm52_vm0 = vcmask 7168   ;;  %vm54_vm1 = vcmask 15360  }
  0xa7   :  { %v51_v16 = vpop.xlane.xlu0 %50 }
  0xa8   :  { %v53_v17 = vsel %vm52_vm0, %v46_v15, %v51_v16 }
  0xa9   :  { %55 = vst.msk [vmem:[%s187_s3] sm:$0xff] %vm54_vm1, %v53_v17 }
  0xaa   :  { %128 = dma.done.wait [#allocation4], 256  }
  0xab   :  { %129 = vsyncadd [#allocation4], 4294967040 }
  0xac   :  { %73 = vsyncpa [#allocation3], 1 }
  0xad   :  { %74 = vsyncpa [#allocation4], 1 }

</bundles_post_ra>
